<compile_context>
chip_gen: v7x
topology: tpu7x:2x2x1
jax: 0.10.0
libtpu: 0.0.40
codegen_flags: <defaults>
</compile_context>

<pallas_src>
import functools
import math

import jax
import jax.numpy as jnp
from jax.experimental import pallas as pl
from jax.experimental.pallas import tpu as pltpu


def _ancde_g_kernel(num_hidden_linears, matmul_dtype, *refs):
    """Fused MLP: linear_in -> relu -> (num_hidden_layers-1) x [linear -> relu]
    -> linear_out -> tanh.

    refs = (z, w_in, b_in, [w_l, b_l]*L, w_out, b_out, out)
    Matmul operands are `matmul_dtype` (bf16 default); accumulation and all
    elementwise math (bias add / ReLU / tanh) stay in f32.
    """
    z_ref = refs[0]
    w_in_ref, b_in_ref = refs[1], refs[2]
    hidden_refs = refs[3:3 + 2 * num_hidden_linears]
    w_out_ref = refs[3 + 2 * num_hidden_linears]
    b_out_ref = refs[4 + 2 * num_hidden_linears]
    out_ref = refs[5 + 2 * num_hidden_linears]

    def dense(x_f32, w_ref, b_ref):
        # weights are already stored in matmul_dtype; cast activations to match.
        y = jnp.dot(x_f32.astype(matmul_dtype), w_ref[...],
                    preferred_element_type=jnp.float32)
        return y + b_ref[...]                       # bias add in f32

    x = z_ref[...].astype(jnp.float32)
    x = jnp.maximum(dense(x, w_in_ref, b_in_ref), 0.0)          # linear_in + relu
    for l in range(num_hidden_linears):                         # hidden linears + relu
        x = jnp.maximum(dense(x, hidden_refs[2 * l], hidden_refs[2 * l + 1]), 0.0)
    y = jnp.tanh(dense(x, w_out_ref, b_out_ref))                # linear_out + tanh (EUP)
    out_ref[...] = y.astype(out_ref.dtype)


def ancde_g_forward(z, params, *, input_channels, hidden_channels,
                    num_hidden_layers, tile_rows=2048,
                    matmul_dtype=jnp.bfloat16):
    """z: (..., hidden_channels) -> (..., hidden_channels, input_channels)."""
    ic, hc = input_channels, hidden_channels
    assert z.shape[-1] == hc
    lead = z.shape[:-1]
    rows = math.prod(lead) if lead else 1
    out_dim = ic * hc
    L = num_hidden_layers - 1

    z2d = z.reshape(rows, hc).astype(jnp.float32)

    # ---- row tiling ------------------------------------------------------
    # Large tiles amortize the ~0.35us/grid-step pipeline overhead; keep the
    # grid at >= 2 steps when possible so the "parallel" axis can be split
    # across v7x's two TensorCores.  Tile must be a multiple of 8 (f32
    # sublane).  Per-row VMEM cost is ~2 KiB, so tile_rows=2048 stays well
    # under the default 32 MiB scoped VMEM on all generations (raise
    # vmem_limit_bytes via CompilerParams only if sweeping much higher).
    req = max(8, (int(tile_rows) // 8) * 8)
    half = max(8, ((((rows + 1) // 2) + 7) // 8) * 8)
    tr = min(req, half)
    padded_rows = ((rows + tr - 1) // tr) * tr
    if padded_rows != rows:                         # ragged tail -> zero pad
        z2d = jnp.pad(z2d, ((0, padded_rows - rows), (0, 0)))
    grid = (padded_rows // tr,)

    # ---- weights ---------------------------------------------------------
    hh = params["w_in"].shape[1]
    w_in = params["w_in"].astype(matmul_dtype)
    b_in = params["b_in"].astype(jnp.float32)
    w_hid = [w.astype(matmul_dtype) for w in params["w_hid"]]
    b_hid = [b.astype(jnp.float32) for b in params["b_hid"]]
    w_out = params["w_out"].astype(matmul_dtype)
    b_out = params["b_out"].astype(jnp.float32)
    assert len(w_hid) == L and len(b_hid) == L

    # Constant index_maps => Pallas keeps these blocks resident and skips
    # re-DMA between grid steps (their block index never changes), so no
    # extra buffering is needed for the weights/biases.
    def full(shape):
        return pl.BlockSpec(shape, lambda i, _n=len(shape): (0,) * _n)

    in_specs = [pl.BlockSpec((tr, hc), lambda i: (i, 0)),   # z row tile
                full((hc, hh)), full((1, hh))]              # linear_in
    for _ in range(L):
        in_specs += [full((hh, hh)), full((1, hh))]         # hidden linears
    in_specs += [full((hh, out_dim)), full((1, out_dim))]   # linear_out

    operands = [z2d, w_in, b_in]
    for w, b in zip(w_hid, b_hid):
        operands += [w, b]
    operands += [w_out, b_out]

    # ---- cost estimate (helps XLA schedule around the custom call) --------
    flops = 2 * padded_rows * (hc * hh + L * hh * hh + hh * out_dim)
    transcendentals = padded_rows * out_dim                 # tanh
    w_bytes = (hc * hh + L * hh * hh + hh * out_dim) * jnp.dtype(matmul_dtype).itemsize
    b_bytes = (hh + L * hh + out_dim) * 4
    bytes_accessed = padded_rows * (hc + out_dim) * 4 + w_bytes + b_bytes
    cost = pl.CostEstimate(flops=int(flops),
                           transcendentals=int(transcendentals),
                           bytes_accessed=int(bytes_accessed))

    out2d = pl.pallas_call(
        functools.partial(_ancde_g_kernel, L, matmul_dtype),
        out_shape=jax.ShapeDtypeStruct((padded_rows, out_dim), z.dtype),
        grid_spec=pltpu.PrefetchScalarGridSpec(
            num_scalar_prefetch=0,
            grid=grid,
            in_specs=in_specs,
            out_specs=pl.BlockSpec((tr, out_dim), lambda i: (i, 0)),
        ),
        compiler_params=pltpu.CompilerParams(
            dimension_semantics=("parallel",)),
        cost_estimate=cost,
    )(*operands)

    out2d = out2d[:rows]
    # .view(*shape[:-1], hidden_channels, input_channels) — pure reshape.
    return out2d.reshape(*lead, hc, ic)


def init_params(key, input_channels, hidden_channels, hidden_hidden_channels,
                num_hidden_layers, dtype=jnp.float32):
    """torch.nn.Linear-style init (U(-1/sqrt(fan_in), 1/sqrt(fan_in))).
    Weights stored transposed: (in_features, out_features)."""
    ic, hc, hh = input_channels, hidden_channels, hidden_hidden_channels
    L = num_hidden_layers - 1

    def linear(k, fan_in, fan_out):
        kw, kb = jax.random.split(k)
        bound = 1.0 / math.sqrt(fan_in)
        w = jax.random.uniform(kw, (fan_in, fan_out), dtype, -bound, bound)
        b = jax.random.uniform(kb, (1, fan_out), dtype, -bound, bound)
        return w, b

    keys = jax.random.split(key, 2 + L)
    w_in, b_in = linear(keys[0], hc, hh)
    w_hid, b_hid = [], []
    for l in range(L):
        w, b = linear(keys[1 + l], hh, hh)
        w_hid.append(w)
        b_hid.append(b)
    w_out, b_out = linear(keys[1 + L], hh, ic * hc)
    return dict(w_in=w_in, b_in=b_in, w_hid=w_hid, b_hid=b_hid,
                w_out=w_out, b_out=b_out)


def reference_forward(z, params, *, input_channels, hidden_channels,
                      num_hidden_layers, matmul_dtype=jnp.bfloat16):
    """Pure-JAX reference of the PyTorch forward (same matmul precision as the
    kernel when matmul_dtype=bf16; pass jnp.float32 for the torch-exact math)."""
    def dense(x, w, b):
        y = jnp.dot(x.astype(matmul_dtype), w.astype(matmul_dtype),
                    preferred_element_type=jnp.float32)
        return y + b[0].astype(jnp.float32)

    x = z.reshape(-1, hidden_channels).astype(jnp.float32)
    x = jnp.maximum(dense(x, params["w_in"], params["b_in"]), 0.0)
    for w, b in zip(params["w_hid"], params["b_hid"]):
        x = jnp.maximum(dense(x, w, b), 0.0)
    y = jnp.tanh(dense(x, params["w_out"], params["b_out"]))
    return y.reshape(*z.shape[:-1], hidden_channels, input_channels)


if __name__ == "__main__":
    # Module hyperparameters (small, consistent with ancde_g's constructor).
    input_channels = 4
    hidden_channels = 32
    hidden_hidden_channels = 32
    num_hidden_layers = 3          # -> 2 extra hidden linears

    key = jax.random.PRNGKey(0)
    kz, kp = jax.random.split(key)

    # z: (batch=2, seq=8, hidden_channels=32)
    z = jax.random.normal(kz, (2, 8, hidden_channels), dtype=jnp.float32)
    params = init_params(kp, input_channels, hidden_channels,
                         hidden_hidden_channels, num_hidden_layers)

    out = ancde_g_forward(z, params,
                          input_channels=input_channels,
                          hidden_channels=hidden_channels,
                          num_hidden_layers=num_hidden_layers,
                          tile_rows=2048)
    out = jax.block_until_ready(out)
    assert out.shape == (2, 8, hidden_channels, input_channels), out.shape

    # Precision-matched reference (bf16 MXU operands, f32 accumulate).
    ref = reference_forward(z, params,
                            input_channels=input_channels,
                            hidden_channels=hidden_channels,
                            num_hidden_layers=num_hidden_layers)
    assert jnp.allclose(out, ref, atol=1e-4, rtol=1e-4), \
        float(jnp.max(jnp.abs(out - ref)))

    # Sanity against the torch-exact f32 math (loose tol for bf16 operands).
    ref_f32 = reference_forward(z, params,
                                input_channels=input_channels,
                                hidden_channels=hidden_channels,
                                num_hidden_layers=num_hidden_layers,
                                matmul_dtype=jnp.float32)
    assert jnp.allclose(out, ref_f32, atol=7e-2), \
        float(jnp.max(jnp.abs(out - ref_f32)))

    print("KERNEL_OK")
</pallas_src>

<mosaic_0001>
module attributes {stable_mosaic.version = 11 : i64} {
  func.func @_ancde_g_kernel(%arg0: i32, %arg1: memref<8x32xf32, #tpu.memory_space<vmem>>, %arg2: memref<32x32xbf16, #tpu.memory_space<vmem>>, %arg3: memref<1x32xf32, #tpu.memory_space<vmem>>, %arg4: memref<32x32xbf16, #tpu.memory_space<vmem>>, %arg5: memref<1x32xf32, #tpu.memory_space<vmem>>, %arg6: memref<32x32xbf16, #tpu.memory_space<vmem>>, %arg7: memref<1x32xf32, #tpu.memory_space<vmem>>, %arg8: memref<32x128xbf16, #tpu.memory_space<vmem>>, %arg9: memref<1x128xf32, #tpu.memory_space<vmem>>, %arg10: memref<8x128xf32, #tpu.memory_space<vmem>>) attributes {dimension_semantics = [#tpu.dimension_semantics<parallel>], iteration_bounds = array<i64: 2>, scalar_prefetch = 0 : i64, scratch_operands = 0 : i64, tpu.core_type = #tpu.core_type<tc>, window_params = [{transform_indices = @transform_0, window_bounds = array<i64: 8, 32>}, {pipeline_mode = #tpu.pipeline_mode<synchronous>, transform_indices = @transform_1, window_bounds = array<i64: 32, 32>}, {pipeline_mode = #tpu.pipeline_mode<synchronous>, transform_indices = @transform_2, window_bounds = array<i64: 1, 32>}, {pipeline_mode = #tpu.pipeline_mode<synchronous>, transform_indices = @transform_3, window_bounds = array<i64: 32, 32>}, {pipeline_mode = #tpu.pipeline_mode<synchronous>, transform_indices = @transform_4, window_bounds = array<i64: 1, 32>}, {pipeline_mode = #tpu.pipeline_mode<synchronous>, transform_indices = @transform_5, window_bounds = array<i64: 32, 32>}, {pipeline_mode = #tpu.pipeline_mode<synchronous>, transform_indices = @transform_6, window_bounds = array<i64: 1, 32>}, {pipeline_mode = #tpu.pipeline_mode<synchronous>, transform_indices = @transform_7, window_bounds = array<i64: 32, 128>}, {pipeline_mode = #tpu.pipeline_mode<synchronous>, transform_indices = @transform_8, window_bounds = array<i64: 1, 128>}, {transform_indices = @transform_9, window_bounds = array<i64: 8, 128>}]} {
    %c0 = arith.constant 0 : index
    %c0_0 = arith.constant 0 : index
    %0 = vector.load %arg1[%c0, %c0_0] : memref<8x32xf32, #tpu.memory_space<vmem>>, vector<8x32xf32>
    %1 = arith.truncf %0 : vector<8x32xf32> to vector<8x32xbf16>
    %c0_1 = arith.constant 0 : index
    %c0_2 = arith.constant 0 : index
    %2 = vector.load %arg2[%c0_1, %c0_2] : memref<32x32xbf16, #tpu.memory_space<vmem>>, vector<32x32xbf16>
    %cst = arith.constant dense<0.000000e+00> : vector<8x32xf32>
    %3 = tpu.matmul %1, %2, %cst {dimension_numbers = #tpu.dot_dimension_numbers<[1], [0], [0], [1], [0, 0, 1, 1], [], []>} : vector<8x32xbf16>, vector<32x32xbf16>, vector<8x32xf32> -> vector<8x32xf32>
    %c0_3 = arith.constant 0 : index
    %c0_4 = arith.constant 0 : index
    %4 = vector.load %arg3[%c0_3, %c0_4] : memref<1x32xf32, #tpu.memory_space<vmem>>, vector<1x32xf32>
    %5 = vector.broadcast %4 : vector<1x32xf32> to vector<8x32xf32>
    %6 = arith.addf %3, %5 : vector<8x32xf32>
    %cst_5 = arith.constant 0.000000e+00 : f32
    %7 = vector.broadcast %cst_5 : f32 to vector<8x32xf32>
    %8 = arith.maximumf %6, %7 : vector<8x32xf32>
    %9 = arith.truncf %8 : vector<8x32xf32> to vector<8x32xbf16>
    %c0_6 = arith.constant 0 : index
    %c0_7 = arith.constant 0 : index
    %10 = vector.load %arg4[%c0_6, %c0_7] : memref<32x32xbf16, #tpu.memory_space<vmem>>, vector<32x32xbf16>
    %cst_8 = arith.constant dense<0.000000e+00> : vector<8x32xf32>
    %11 = tpu.matmul %9, %10, %cst_8 {dimension_numbers = #tpu.dot_dimension_numbers<[1], [0], [0], [1], [0, 0, 1, 1], [], []>} : vector<8x32xbf16>, vector<32x32xbf16>, vector<8x32xf32> -> vector<8x32xf32>
    %c0_9 = arith.constant 0 : index
    %c0_10 = arith.constant 0 : index
    %12 = vector.load %arg5[%c0_9, %c0_10] : memref<1x32xf32, #tpu.memory_space<vmem>>, vector<1x32xf32>
    %13 = vector.broadcast %12 : vector<1x32xf32> to vector<8x32xf32>
    %14 = arith.addf %11, %13 : vector<8x32xf32>
    %cst_11 = arith.constant 0.000000e+00 : f32
    %15 = vector.broadcast %cst_11 : f32 to vector<8x32xf32>
    %16 = arith.maximumf %14, %15 : vector<8x32xf32>
    %17 = arith.truncf %16 : vector<8x32xf32> to vector<8x32xbf16>
    %c0_12 = arith.constant 0 : index
    %c0_13 = arith.constant 0 : index
    %18 = vector.load %arg6[%c0_12, %c0_13] : memref<32x32xbf16, #tpu.memory_space<vmem>>, vector<32x32xbf16>
    %cst_14 = arith.constant dense<0.000000e+00> : vector<8x32xf32>
    %19 = tpu.matmul %17, %18, %cst_14 {dimension_numbers = #tpu.dot_dimension_numbers<[1], [0], [0], [1], [0, 0, 1, 1], [], []>} : vector<8x32xbf16>, vector<32x32xbf16>, vector<8x32xf32> -> vector<8x32xf32>
    %c0_15 = arith.constant 0 : index
    %c0_16 = arith.constant 0 : index
    %20 = vector.load %arg7[%c0_15, %c0_16] : memref<1x32xf32, #tpu.memory_space<vmem>>, vector<1x32xf32>
    %21 = vector.broadcast %20 : vector<1x32xf32> to vector<8x32xf32>
    %22 = arith.addf %19, %21 : vector<8x32xf32>
    %cst_17 = arith.constant 0.000000e+00 : f32
    %23 = vector.broadcast %cst_17 : f32 to vector<8x32xf32>
    %24 = arith.maximumf %22, %23 : vector<8x32xf32>
    %25 = arith.truncf %24 : vector<8x32xf32> to vector<8x32xbf16>
    %c0_18 = arith.constant 0 : index
    %c0_19 = arith.constant 0 : index
    %26 = vector.load %arg8[%c0_18, %c0_19] : memref<32x128xbf16, #tpu.memory_space<vmem>>, vector<32x128xbf16>
    %cst_20 = arith.constant dense<0.000000e+00> : vector<8x128xf32>
    %27 = tpu.matmul %25, %26, %cst_20 {dimension_numbers = #tpu.dot_dimension_numbers<[1], [0], [0], [1], [0, 0, 1, 1], [], []>} : vector<8x32xbf16>, vector<32x128xbf16>, vector<8x128xf32> -> vector<8x128xf32>
    %c0_21 = arith.constant 0 : index
    %c0_22 = arith.constant 0 : index
    %28 = vector.load %arg9[%c0_21, %c0_22] : memref<1x128xf32, #tpu.memory_space<vmem>>, vector<1x128xf32>
    %29 = vector.broadcast %28 : vector<1x128xf32> to vector<8x128xf32>
    %30 = arith.addf %27, %29 : vector<8x128xf32>
    %31 = math.tanh %30 : vector<8x128xf32>
    %c0_23 = arith.constant 0 : index
    %c0_24 = arith.constant 0 : index
    %32 = vector.load %arg10[%c0_23, %c0_24] : memref<8x128xf32, #tpu.memory_space<vmem>>, vector<8x128xf32>
    tpu.vector_store %arg10[%c0_23, %c0_24], %31 {strides = array<i32>} : memref<8x128xf32, #tpu.memory_space<vmem>>, vector<8x128xf32>,
    return
  }
  func.func @transform_0(%arg0: i32) -> (i32, i32) {
    %c0_i32 = arith.constant 0 : i32
    %c0_i32_0 = arith.constant 0 : i32
    return %arg0, %c0_i32 : i32, i32
  }
  func.func @transform_1(%arg0: i32) -> (i32, i32) {
    %c0_i32 = arith.constant 0 : i32
    %c0_i32_0 = arith.constant 0 : i32
    %c0_i32_1 = arith.constant 0 : i32
    return %c0_i32, %c0_i32_0 : i32, i32
  }
  func.func @transform_2(%arg0: i32) -> (i32, i32) {
    %c0_i32 = arith.constant 0 : i32
    %c0_i32_0 = arith.constant 0 : i32
    %c0_i32_1 = arith.constant 0 : i32
    return %c0_i32, %c0_i32_0 : i32, i32
  }
  func.func @transform_3(%arg0: i32) -> (i32, i32) {
    %c0_i32 = arith.constant 0 : i32
    %c0_i32_0 = arith.constant 0 : i32
    %c0_i32_1 = arith.constant 0 : i32
    return %c0_i32, %c0_i32_0 : i32, i32
  }
  func.func @transform_4(%arg0: i32) -> (i32, i32) {
    %c0_i32 = arith.constant 0 : i32
    %c0_i32_0 = arith.constant 0 : i32
    %c0_i32_1 = arith.constant 0 : i32
    return %c0_i32, %c0_i32_0 : i32, i32
  }
  func.func @transform_5(%arg0: i32) -> (i32, i32) {
    %c0_i32 = arith.constant 0 : i32
    %c0_i32_0 = arith.constant 0 : i32
    %c0_i32_1 = arith.constant 0 : i32
    return %c0_i32, %c0_i32_0 : i32, i32
  }
  func.func @transform_6(%arg0: i32) -> (i32, i32) {
    %c0_i32 = arith.constant 0 : i32
    %c0_i32_0 = arith.constant 0 : i32
    %c0_i32_1 = arith.constant 0 : i32
    return %c0_i32, %c0_i32_0 : i32, i32
  }
  func.func @transform_7(%arg0: i32) -> (i32, i32) {
    %c0_i32 = arith.constant 0 : i32
    %c0_i32_0 = arith.constant 0 : i32
    %c0_i32_1 = arith.constant 0 : i32
    return %c0_i32, %c0_i32_0 : i32, i32
  }
  func.func @transform_8(%arg0: i32) -> (i32, i32) {
    %c0_i32 = arith.constant 0 : i32
    %c0_i32_0 = arith.constant 0 : i32
    %c0_i32_1 = arith.constant 0 : i32
    return %c0_i32, %c0_i32_0 : i32, i32
  }
  func.func @transform_9(%arg0: i32) -> (i32, i32) {
    %c0_i32 = arith.constant 0 : i32
    %c0_i32_0 = arith.constant 0 : i32
    return %arg0, %c0_i32 : i32, i32
  }
}

</mosaic_0001>

<bundles_post_ra>
// kernel: tpu_custom_call.1
= control target key start
LH: loop header
LB: loop body
LE: loop exit
PB: predicated region body
PF: predicated region fallthrough
CT: control target
= control target key end

     0   :  { %s1492_s0 = inlined_call_operand.hbm [shape: f32[16,32], index: 0, kind: input, shape index: {}]   ;;  %s1493_s1 = inlined_call_operand.hbm [shape: bf16[32,32], index: 1, kind: input, shape index: {}]   ;;  %s1494_s2 = inlined_call_operand.vmem [shape: f32[1,32], index: 2, kind: input, shape index: {}]   ;;  %s1495_s3 = inlined_call_operand.hbm [shape: bf16[32,32], index: 3, kind: input, shape index: {}]   ;;  %s1496_s4 = inlined_call_operand.vmem [shape: f32[1,32], index: 4, kind: input, shape index: {}]   ;;  %s1497_s5 = inlined_call_operand.vmem [shape: bf16[32,32], index: 5, kind: input, shape index: {}]   ;;  %s1498_s6 = inlined_call_operand.vmem [shape: f32[1,32], index: 6, kind: input, shape index: {}]   ;;  %s1499_s7 = inlined_call_operand.hbm [shape: bf16[32,128], index: 7, kind: input, shape index: {}]   ;;  %s1500_s8 = inlined_call_operand.vmem [shape: f32[1,128], index: 8, kind: input, shape index: {}]   ;;  %s1501_s9 = inlined_call_operand.hbm [shape: f32[16,128], index: 9, kind: output, shape index: {}]  }
   0x1   :  { %1508 = sst [smem:[#allocation17_spill]] %s1501_s9 }
   0x2   :  { %14 = vsyncpa [#allocation3], 0 }
   0x3   :  { %16 = vsyncpa [#allocation3 + $0x1], 0 }
   0x4   :  { %17 = vsyncpa [#allocation6], 0 }
   0x5   :  { %18 = vsyncpa [#allocation9], 0 }
   0x6   :  { %19 = vsyncpa [#allocation4], 0 }
   0x7   :  { %21 = vsyncpa [#allocation4 + $0x1], 0  ;;  %s1199_s30 = smov 0   ;;  %s1201_s10 = smov 0  }
   0x8   :  { %s1203_s11 = smov 0   ;;  %s1205_s12 = smov 0  }
   0x9 LB: > { %1509 = sst [smem:[#allocation15_spill]] %s1126_s30  ;;  %s1220_s13 = sadd.s32 4294967295, %s1138_s12   ;;  %s1138_s12 = sphi %s1205_s12, %s1533_s12   ;;  %s1134_s11 = sphi %s1203_s11, %s1532_s11   ;;  %s1130_s10 = sphi %s1201_s10, %s1531_s10   ;;  %s1126_s30 = sphi %s1199_s30, %s1530_s30  }
   0xa   : > { %s781_s14 = sadd.s32 4294967294, %s1138_s12   ;;  %p47_p0 = scmp.ne.s32.totalorder %s1130_s10, %s1126_s30 }
   0xb   : > { %p1502_p1 = scmp.eq.s32.totalorder %s1220_s13, 0  ;;  %p245_p3 = scmp.eq.s32.totalorder %s781_s14, 1 }
   0xc   : > { %p782_p5 = scmp.ge.s32.totalorder %s1138_s12, 1  ;;  %p252_p7 = scmp.lt.s32.totalorder %s1138_s12, 3 }
   0xd   : > { %p1229_p4 = por %p1502_p1, %p47_p0  ;;  %p1234_p6 = por %p245_p3, %p47_p0 }
   0xe   : > { %p1239_p8 = pnand %p782_p5, %p252_p7  ;;  %s1140_s18 = smov [#allocation5]  }
   0xf   : > { %s1510_s15 = scalar_select %p1229_p4, 1, 0 }
  0x10   : > { %s1511_s16 = scalar_select %p1234_p6, 1, 0 }
  0x11   : > { %s1513_s17 = scalar_select %p1239_p8, 1, 0 }
  0x12   : > { %1512 = sst [smem:[#allocation16_spill]] %s1511_s16  ;;  %s264_s19 = sshll.u32 %s1140_s18, 4  ;;  %s1243_s19 = int_to_ptr.vmem [resolvable:$true] %s264_s19 }
  0x13   : > { %p875_p9 = pneg %p1239_p8  ;;  %s1141_s21 = smov [#allocation7]  }
  0x14   : > { %s280_s22 = sshll.u32 %s1141_s21, 4  ;;  %s1142_s23 = smov [#allocation8]   ;;  %s1254_s22 = int_to_ptr.vmem [resolvable:$true] %s280_s22 }
  0x15   : > { %p1250_p11 = pnand %p875_p9, %p1502_p1  ;;  %s1256_s24 = sshll.u32 %s1142_s23, 4  ;;  %s303_s24 = int_to_ptr.vmem [resolvable:$true] %s1256_s24 }
  0x16   : > { %s950_s27 = scalar_lea.hbm %s1493_s1, 256 }
  0x17   : > { %p951_p12 = scmp.ne.s32.totalorder %s1493_s1, %s950_s27  ;;  %p1266_p13 = pneg %p1250_p11 }
  0x18   : > { %p957_p5 = scmp.lt.u32.totalorder %s950_s27, %s1493_s1 }
  0x19   : > { %p953_p0 = pnand %p1266_p13, %p951_p12 }
  0x1b   : > { %p954_p3 = pneg %p953_p0 }
  0x1d   : > { %p959_p7 = pnand %p957_p5, %p954_p3 }
  0x1f   : > { %962 = shalt.err (!%p959_p7)
}
  0x20   : > { %s963_s23 = scalar_lea.vmem %s1243_s19, 256  ;;  %p971_p2 = scmp.lt.s32.totalorder %s1243_s19, %s1243_s19 }
  0x21   : > { %p964_p9 = scmp.ne.s32.totalorder %s1243_s19, %s963_s23  ;;  %p972_p6 = scmp.lt.s32.totalorder %s963_s23, %s963_s23 }
  0x23   : > { %p966_p10 = pnand %p964_p9, %p1266_p13  ;;  %p973_p12 = por %p972_p6, %p971_p2 }
  0x25   : > { %p967_p1 = pneg %p966_p10 }
  0x27   : > { %p974_p0 = pnand %p973_p12, %p967_p1 }
  0x29   : > { %977 = shalt.err (!%p974_p0)
}
  0x2a   : > { %s1143_s25 = smov 64   ;;  %s1144_s26 = smov 4  }
  0x2b   : > { %878 = dma.hbm_to_vmem [thread:$0]  (!%p1250_p11), %s1493_s1, 256, %s1243_s19, [#allocation6], %s1143_s25, %s1143_s25, %s1144_s26  }
  0x2c   : > { %s978_s21 = scalar_lea.hbm %s1495_s3, 256 }
  0x2d   : > { %p979_p1 = scmp.ne.s32.totalorder %s1495_s3, %s978_s21  ;;  %p985_p10 = scmp.lt.u32.totalorder %s978_s21, %s1495_s3 }
  0x2f   : > { %p981_p2 = pnand %p979_p1, %p1266_p13 }
  0x31   : > { %p982_p6 = pneg %p981_p2 }
  0x33   : > { %p987_p3 = pnand %p985_p10, %p982_p6 }
  0x35   : > { %990 = shalt.err (!%p987_p3)
}
  0x36   : > { %s991_s19 = scalar_lea.vmem %s1254_s22, 256  ;;  %p999_p12 = scmp.lt.s32.totalorder %s1254_s22, %s1254_s22 }
  0x37   : > { %p992_p5 = scmp.ne.s32.totalorder %s1254_s22, %s991_s19  ;;  %p1000_p0 = scmp.lt.s32.totalorder %s991_s19, %s991_s19 }
  0x39   : > { %p994_p7 = pnand %p992_p5, %p1266_p13  ;;  %p1001_p1 = por %p1000_p0, %p999_p12 }
  0x3b   : > { %p995_p9 = pneg %p994_p7 }
  0x3d   : > { %p1002_p2 = pnand %p1001_p1, %p995_p9 }
  0x3f   : > { %1005 = shalt.err (!%p1002_p2)
}
  0x40   : > { %881 = dma.hbm_to_vmem [thread:$0]  (!%p1250_p11), %s1495_s3, 256, %s1254_s22, [#allocation6], %s1143_s25, %s1143_s25, %s1144_s26  }
  0x41   : > { %s1006_s28 = scalar_lea.hbm %s1499_s7, 256 }
  0x42   : > { %p1007_p6 = scmp.ne.s32.totalorder %s1499_s7, %s1006_s28  ;;  %p1013_p5 = scmp.lt.u32.totalorder %s1006_s28, %s1499_s7 }
  0x44   : > { %p1009_p10 = pnand %p1007_p6, %p1266_p13 }
  0x46   : > { %p1010_p3 = pneg %p1009_p10 }
  0x48   : > { %p1015_p7 = pnand %p1013_p5, %p1010_p3 }
  0x4a   : > { %1018 = shalt.err (!%p1015_p7)
}
  0x4b   : > { %s1019_s19 = scalar_lea.vmem %s303_s24, 256  ;;  %p1027_p1 = scmp.lt.s32.totalorder %s303_s24, %s303_s24 }
  0x4c   : > { %p1020_p9 = scmp.ne.s32.totalorder %s303_s24, %s1019_s19  ;;  %p1028_p2 = scmp.lt.s32.totalorder %s1019_s19, %s1019_s19 }
  0x4e   : > { %p1022_p12 = pnand %p1020_p9, %p1266_p13  ;;  %p1029_p4 = por %p1028_p2, %p1027_p1 }
  0x50   : > { %p1023_p0 = pneg %p1022_p12 }
  0x52   : > { %p1030_p8 = pnand %p1029_p4, %p1023_p0 }
  0x54   : > { %1033 = shalt.err (!%p1030_p8)
}
  0x55   : > { %884 = dma.hbm_to_vmem [thread:$0]  (!%p1250_p11), %s1499_s7, 256, %s303_s24, [#allocation9], %s1143_s25, %s1143_s25, %s1144_s26  }
  0x56   : > { %s1339_s14 = sadd.s32 1, %s1138_s12   ;;  %s34_s30 = sadd.s32 1, %s1134_s11 }
  0x57   : > { %s31_s20 = ssub.s32 %s1138_s12, %s1339_s14  ;;  %p41_p8 = scmp.ne.s32.totalorder %s1134_s11, %s1130_s10 }
  0x58   : > { %p32_p4 = scmp.eq.s32.totalorder %s31_s20, 0  ;;  %p42_p13 = scmp.eq.s32.totalorder %s1138_s12, 0 }
  0x59   : > { %p896_p6 = scmp.lt.s32.totalorder %s1138_s12, 2  ;;  %p1516_p3 = scmp.eq.s32.totalorder %s1220_s13, 1 }
  0x5a   : > { %s1349_s16 = scalar_select %p32_p4, %s1134_s11, %s34_s30  }
  0x5b   : > { %p43_p10 = por %p42_p13, %p41_p8  ;;  %p1353_p5 = por %p1516_p3, %p41_p8 }
  0x5c   : > { %s319_s28 = sand.u32 1, %s1134_s11   ;;  %s788_s29 = sshll.u32 %s1138_s12, 7 }
  0x5d   : > { %s787_s24 = sshll.u32 %s319_s28, 3  ;;  %s1362_s18 = scalar_lea.hbm %s1492_s0, %s788_s29 }
  0x5e   : > { %s323_s21 = scalar_lea.vmem [#allocation2], %s787_s24  ;;  %p1364_p11 = pnand %p896_p6, %p43_p10 }
  0x5f   : > { %s330_s23 = sshll.u32 %s323_s21, 4  ;;  %s320_s22 = scalar_lea.sflag [#allocation3], %s319_s28  ;;  %s1368_s23 = int_to_ptr.vmem [resolvable:$true] %s330_s23 }
  0x60   : > { %s1034_s9 = scalar_lea.hbm %s1362_s18, 128  ;;  %p1036_p9 = pneg %p1364_p11 }
  0x61   : > { %p1035_p7 = scmp.ne.s32.totalorder %s1362_s18, %s1034_s9  ;;  %s1039_s29 = scalar_lea.hbm %s1492_s0, 256 }
  0x62   : > { %p1040_p1 = scmp.lt.u32.totalorder %s1362_s18, %s1492_s0  ;;  %p1041_p2 = scmp.lt.u32.totalorder %s1039_s29, %s1034_s9 }
  0x63   : > { %p1037_p12 = pnand %p1036_p9, %p1035_p7  ;;  %p1043_p8 = scmp.lt.u32.totalorder %s1034_s9, %s1362_s18 }
  0x64   : > { %p1042_p4 = por %p1041_p2, %p1040_p1 }
  0x65   : > { %p1038_p0 = pneg %p1037_p12 }
  0x66   : > { %p1044_p13 = por %p1043_p8, %p1042_p4 }
  0x68   : > { %p1045_p6 = pnand %p1044_p13, %p1038_p0 }
  0x6a   : > { %1048 = shalt.err (!%p1045_p6)
}
  0x6b   : > { %s1049_s28 = scalar_lea.vmem %s1368_s23, 128  ;;  %s1145_s26 = smov [#allocation2]  }
  0x6c   : > { %p1050_p10 = scmp.ne.s32.totalorder %s1368_s23, %s1049_s28  ;;  %s1054_s21 = sshll.u32 %s1145_s26, 4  ;;  %s1055_s21 = int_to_ptr.vmem [resolvable:$false] %s1054_s21 }
  0x6d   : > { %s1056_s20 = scalar_lea.vmem %s1055_s21, 256  ;;  %p1057_p12 = scmp.lt.s32.totalorder %s1368_s23, %s1055_s21 }
  0x6e   : > { %p1052_p3 = pnand %p1050_p10, %p1036_p9  ;;  %p1058_p1 = scmp.lt.s32.totalorder %s1056_s20, %s1049_s28 }
  0x70   : > { %p1053_p7 = pneg %p1052_p3  ;;  %p1059_p2 = por %p1058_p1, %p1057_p12 }
  0x72   : > { %p1060_p4 = pnand %p1059_p2, %p1053_p7 }
  0x74   : > { %1063 = shalt.err (!%p1060_p4)
}
  0x75   : > { %888 = dma.hbm_to_vmem [thread:$0]  (!%p1364_p11), %s1362_s18, 128, %s1368_s23, %s320_s22  }
  0x76   : > { %p1519_p0 = scmp.ne.s32.totalorder %s1513_s17, 0 }
  0x77   : > { %s1398_s9 = sand.u32 (!%p1519_p0), 1, %s1130_s10   ;;  %p1520_p9 = scmp.ne.s32.totalorder (!%p1519_p0), %s1510_s15, 0 }
  0x78   : > { %339 = sbr.rel (%p1519_p0) target bundleno = 1038 (0x40e), region = 56  ;;  %s790_s30 = sshll.u32 (!%p1519_p0), %s1398_s9, 3 }
  0x79   : > { %s342_s29 = scalar_lea.sflag (!%p1519_p0), [#allocation3], %s1398_s9  ;;  %s345_s24 = scalar_lea.vmem (!%p1519_p0), [#allocation2], %s790_s30 }
  0x7f   : > { %1109 = dma.done.wait (%p1520_p9), %s342_s29, 128  }
  0x80   : > { %1111 = vsyncadd (%p1520_p9), %s342_s29, 4294967168  ;;  %p1521_p11 = scmp.eq.s32.totalorder %s1220_s13, 0 }
  0x82   : > { %1113 = dma.done.wait (%p1521_p11), [#allocation6], 512   ;;  %p1522_p8 = pmov %p1521_p11 }
  0x84   : > { %1115 = vsyncadd (%p1522_p8), [#allocation6], 4294966784  ;;  %p1523_p13 = pmov %p1522_p8 }
  0x85   : > { %p1524_p6 = pmov %p1522_p8 }
  0x86   : > { %1117 = dma.done.wait (%p1523_p13), [#allocation9], 256  }
  0x87   : > { %1119 = vsyncadd (%p1524_p6), [#allocation9], 4294967040  ;;  %v1146_v0 = vmov 0.0   ;;  %vm1147_vm0 = vmmov 0   ;;  %v940_v1 = vld [vmem:[#allocation5] sm:$0xff]   ;;  %v941_v2 = vld [vmem:[#allocation5 + $0x8] sm:$0xff]  }
  0x88   : > { %827 = vmatprep.subr.bf16.mxu0 %v1146_v0  ;;  %831 = vmatprep.mubr.msk.bf16.mxu0 %vm1147_vm0, %v1146_v0  ;;  %v393_v3 = vld [vmem:[%s345_s24] sm:$0xff]  ;;  %vm418_vm1 = vcmask 261120   ;;  %v946_v17 = vld [vmem:[#allocation8] sm:$0xff]   ;;  %v947_v26 = vld [vmem:[#allocation8 + $0x8] sm:$0xff]   ;;  %s812_s24 = sshll.u32 %s1220_s13, 7  ;;  %s391_s15 = scalar_lea.vmem [#allocation10], %s790_s30 }
  0x89   : > { %835 = vmatprep.subr.bf16.mxu1 %v1146_v0  ;;  %839 = vmatprep.mubr.msk.bf16.mxu1 %vm1147_vm0, %v1146_v0  ;;  %v394_v4 = vpack.c.bf16 %v393_v3, %v393_v3  ;;  %v942_v5 = vld [vmem:[#allocation7] sm:$0xff]   ;;  %v943_v6 = vld [vmem:[#allocation7 + $0x8] sm:$0xff]   ;;  %s682_s17 = sshll.u32 %s391_s15, 4  ;;  %s1525_s19 = sld [smem:[#allocation17_spill]]  ;;  %s1450_s17 = int_to_ptr.vmem [resolvable:$true] %s682_s17 }
  0x8a   : > { %828 = vmatpush3.bf16.msra.mxu0 %v940_v1  ;;  %836 = vmatpush3.bf16.msra.mxu1 %v942_v5  ;;  %v944_v7 = vld [vmem:[%s1497_s5] sm:$0xff]   ;;  %v945_v16 = vld [vmem:[%s1497_s5 + $0x8] sm:$0xff]   ;;  %s669_s25 = scalar_lea.sflag [#allocation4], %s1398_s9  ;;  %s1064_s28 = scalar_lea.vmem %s1450_s17, 128 }
  0x8b   : > { %829 = vmatprep.subr.bf16.mxu0 %v1146_v0  ;;  %837 = vmatprep.subr.bf16.mxu1 %v1146_v0  ;;  %v795_v8 = vld [vmem:[%s1494_s2] ss:$0 sm:$0xff]  ;;  %p1065_p10 = scmp.ne.s32.totalorder %s1450_s17, %s1064_s28  ;;  %s1148_s13 = smov [#allocation10]  }
  0x8c   : > { %v799_v18 = vld [vmem:[%s1496_s4] ss:$0 sm:$0xff]  ;;  %s1068_s30 = sshll.u32 %s1148_s13, 4  ;;  %s1069_s30 = int_to_ptr.vmem [resolvable:$false] %s1068_s30 }
  0x8d   : > { %v803_v27 = vld [vmem:[%s1498_s6] ss:$0 sm:$0xff]  ;;  %p1066_p3 = pnand %p1065_p10, %p1353_p5  ;;  %s1070_s26 = scalar_lea.vmem %s1069_s30, 256 }
  0x8e   : > { %830 = vmatpush3.bf16.msra.mxu0 %v941_v2  ;;  %838 = vmatpush3.bf16.msra.mxu1 %v943_v6  ;;  %v807_v35 = vld [vmem:[%s1500_s8] ss:$0 sm:$0xff]  ;;  %p1071_p12 = scmp.lt.s32.totalorder %s1450_s17, %s1069_s30  ;;  %p1072_p1 = scmp.lt.s32.totalorder %s1070_s26, %s1064_s28 }
  0x8f   : > { %843 = vmatprep.subr.bf16.mxu0 %v1146_v0  ;;  %851 = vmatprep.subr.bf16.mxu1 %v1146_v0  ;;  %s1448_s22 = scalar_lea.hbm %s1525_s19, %s812_s24  ;;  %p1067_p7 = pneg %p1066_p3 }
  0x90   : > { %p1073_p2 = por %p1072_p1, %p1071_p12 }
  0x91   : > { %832 = vmatmul.mubr.msk.bf16.vlgmr.msra.gmra.mrb[0].mxu0 %vm418_vm1, %v394_v4 }
  0x92   : > { %847 = vmatprep.mubr.msk.bf16.mxu0 %vm1147_vm0, %v1146_v0  ;;  %844 = vmatpush3.bf16.msra.mxu0 %v944_v7  ;;  %p1074_p4 = pnand %p1073_p2, %p1067_p7 }
  0x93   : > { %845 = vmatprep.subr.bf16.mxu0 %v1146_v0 }
  0x96   : > { %846 = vmatpush3.bf16.msra.mxu0 %v945_v16 }
 0x164   : > { %v456_v9 = vpop.f32.mrb[0].mxu0 }
 0x165   : > { %v457_v10 = vadd.f32 %v795_v8, %v456_v9  ;;  %v833_v11 = vpop.f32.mrb[1].mxu0 }
 0x166   : > { %v459_v12 = vpop.f32.mrb[2].mxu0 }
 0x167   : > { %v462_v13 = vmax.f32 %v457_v10, 0.0  ;;  %v834_v14 = vpop.f32.mrb[3].mxu0 }
 0x169   : > { %v463_v15 = vpack.c.bf16 %v462_v13, %v462_v13 }
 0x16b   : > { %840 = vmatmul.mubr.msk.bf16.vlgmr.msra.gmra.mrb[0].mxu1 %vm418_vm1, %v463_v15 }
 0x16c   : > { %855 = vmatprep.mubr.msk.bf16.mxu1 %vm1147_vm0, %v1146_v0  ;;  %852 = vmatpush3.bf16.msra.mxu1 %v946_v17 }
 0x16d   : > { %853 = vmatprep.subr.bf16.mxu1 %v1146_v0 }
 0x170   : > { %854 = vmatpush3.bf16.msra.mxu1 %v947_v26 }
 0x23e   : > { %v524_v19 = vpop.f32.mrb[0].mxu1 }
 0x23f   : > { %v525_v20 = vadd.f32 %v799_v18, %v524_v19  ;;  %v841_v21 = vpop.f32.mrb[1].mxu1 }
 0x240   : > { %v527_v22 = vpop.f32.mrb[2].mxu1 }
 0x241   : > { %v530_v23 = vmax.f32 %v525_v20, 0.0  ;;  %v842_v24 = vpop.f32.mrb[3].mxu1 }
 0x243   : > { %v531_v25 = vpack.c.bf16 %v530_v23, %v530_v23 }
 0x245   : > { %848 = vmatmul.mubr.msk.bf16.vlgmr.msra.gmra.mrb[4].mxu0 %vm418_vm1, %v531_v25 }
 0x318   : > { %v592_v28 = vpop.f32.mrb[4].mxu0 }
 0x319   : > { %v593_v29 = vadd.f32 %v803_v27, %v592_v28  ;;  %v849_v30 = vpop.f32.mrb[5].mxu0 }
 0x31a   : > { %v595_v31 = vpop.f32.mrb[6].mxu0 }
 0x31b   : > { %v598_v32 = vmax.f32 %v593_v29, 0.0  ;;  %v850_v33 = vpop.f32.mrb[7].mxu0 }
 0x31d   : > { %v599_v34 = vpack.c.bf16 %v598_v32, %v598_v32 }
 0x31f   : > { %856 = vmatmul.mubr.msk.bf16.vlgmr.msra.gmra.mrb[4].mxu1 %vm418_vm1, %v599_v34 }
 0x3f2   : > { %v660_v36 = vpop.f32.mrb[4].mxu1 }
 0x3f3   : > { %v661_v37 = vadd.f32 %v807_v35, %v660_v36  ;;  %v857_v38 = vpop.f32.mrb[5].mxu1 }
 0x3f4   : > { %v663_v39 = vpop.f32.mrb[6].mxu1 }
 0x3f5   : > { %948 = vtanh.f32 %v661_v37  ;;  %v858_v40 = vpop.f32.mrb[7].mxu1 }
 0x3ff   : > { %v949_v41 = vpop.eup %948 }
 0x400   : > { %667 = vst [vmem:[%s391_s15] sm:$0xff] %v949_v41 }
 0x401   : > { %1077 = shalt.err (!%p1074_p4)
}
 0x402   : > { %s1078_s9 = scalar_lea.hbm %s1448_s22, 128  ;;  %s1082_s29 = scalar_lea.hbm %s1525_s19, 256 }
 0x403   : > { %p1079_p0 = scmp.ne.s32.totalorder %s1448_s22, %s1078_s9  ;;  %p1083_p8 = scmp.lt.u32.totalorder %s1448_s22, %s1525_s19 }
 0x404   : > { %p1084_p13 = scmp.lt.u32.totalorder %s1082_s29, %s1078_s9  ;;  %p1086_p10 = scmp.lt.u32.totalorder %s1078_s9, %s1448_s22 }
 0x405   : > { %p1080_p9 = pnand %p1079_p0, %p1353_p5 }
 0x406   : > { %p1085_p6 = por %p1084_p13, %p1083_p8 }
 0x407   : > { %p1081_p11 = pneg %p1080_p9 }
 0x408   : > { %p1087_p3 = por %p1086_p10, %p1085_p6 }
 0x40a   : > { %p1088_p7 = pnand %p1087_p3, %p1081_p11 }
 0x40c   : > { %1091 = shalt.err (!%p1088_p7)
}
 0x40d   : > { %873 = dma.vmem_to_hbm [thread:$0]  (%p1353_p5), %s1450_s17, 128, %s1448_s22, %s669_s25  }
 0x40e PF: > { %s1526_s18 = sld [smem:[#allocation15_spill]]  ;;  %s1527_s23 = sld [smem:[#allocation16_spill]] }
 0x40f   : > { %p1529_p1 = scmp.ge.s32.totalorder %s1138_s12, 2 }
 0x414   : > { %s694_s28 = sand.u32 1, %s1526_s18   ;;  %p1528_p12 = scmp.ne.s32.totalorder %s1527_s23, 0 }
 0x415   : > { %s695_s13 = scalar_lea.sflag [#allocation4], %s694_s28 }
 0x416   : > { %p890_p2 = pnand %p1529_p1, %p1528_p12 }
 0x418   : > { %1121 = dma.done.wait (!%p890_p2), %s695_s13, 128  }
 0x419   : > { %1123 = vsyncadd (!%p890_p2), %s695_s13, 4294967168  ;;  %p24_p4 = scmp.ge.s32.totalorder %s1339_s14, 4   ;;  %s1530_s30 = smov %s1130_s10 }
 0x41a   : > { %s1531_s10 = smov %s1134_s11  ;;  %s1532_s11 = smov %s1349_s16 }
 0x41b   : > { %s1533_s12 = smov %s1339_s14  ;;  %26 = sbr.rel (!%p24_p4) target bundleno = 9 (0x9), region = 113 }
 0x422   :  { %700 = vsyncpa [#allocation3], 1 }
 0x423   :  { %702 = vsyncpa [#allocation3 + $0x1], 1 }
 0x424   :  { %703 = vsyncpa [#allocation6], 1 }
 0x425   :  { %704 = vsyncpa [#allocation9], 1 }
 0x426   :  { %705 = vsyncpa [#allocation4], 1 }
 0x427   :  { %707 = vsyncpa [#allocation4 + $0x1], 1 }

</bundles_post_ra>
